<compile_context>
chip_gen: v6e
topology: v6e:2x2x1
jax: 0.10.0
libtpu: 0.0.40
codegen_flags: <defaults>
</compile_context>

<pallas_src>
import functools
import math

import jax
import jax.numpy as jnp
from jax.experimental import pallas as pl
from jax.experimental.pallas import tpu as pltpu


# ----------------------------------------------------------------------------
# Table construction (matches get_sinusoid_encoding_table + repeat_interleave).
# ----------------------------------------------------------------------------
def make_rope_tables(max_position: int, embedding_size: int):
    position = jnp.arange(max_position, dtype=jnp.float32)[:, None]           # (P, 1)
    div_term = jnp.exp(
        jnp.arange(0, embedding_size, 2, dtype=jnp.float32)
        * (-math.log(10000.0) / embedding_size)
    )                                                                          # (D/2,)
    sin_half = jnp.sin(position * div_term)                                    # (P, D/2)
    cos_half = jnp.cos(position * div_term)                                    # (P, D/2)
    cos_position = jnp.repeat(cos_half, 2, axis=-1)                            # (P, D)
    sin_position = jnp.repeat(sin_half, 2, axis=-1)                            # (P, D)
    return cos_position, sin_position


# ----------------------------------------------------------------------------
# Small hardware / convention probes (run once, cached).
# ----------------------------------------------------------------------------
@functools.lru_cache(maxsize=None)
def _vmem_capacity_bytes() -> int:
    try:
        return int(pltpu.get_tpu_info().vmem_capacity_bytes)
    except Exception:
        return 64 * 1024 * 1024  # conservative: assume v7x-class (64 MiB / TC)


@functools.lru_cache(maxsize=None)
def _pltpu_roll_matches_jnp() -> bool:
    """True iff pltpu.roll(x, s, ax) == jnp.roll(x, s, ax) for positive s."""
    def probe_kernel(x_ref, o_ref):
        o_ref[...] = pltpu.roll(x_ref[...], 1, 1)

    try:
        x = jnp.arange(8 * 128, dtype=jnp.float32).reshape(8, 128)
        y = pl.pallas_call(
            probe_kernel, out_shape=jax.ShapeDtypeStruct((8, 128), jnp.float32)
        )(x)
        return abs(float(jax.device_get(y)[0, 0]) - 127.0) < 0.5
    except Exception:
        return True  # jnp.roll convention is the documented/expected one


def _pick_lane_width(n: int, max_width: int = 2048):
    """Largest multiple-of-128 divisor of n (<= max_width), else None."""
    best = None
    w = 128
    while w <= min(n, max_width):
        if n % w == 0:
            best = w
        w += 128
    return best


# ----------------------------------------------------------------------------
# Kernel.
# ----------------------------------------------------------------------------
def _rope_kernel(qw_ref, cos_ref, sin_e_ref, sin_o_ref, out_ref, *,
                 up_shift, down_shift):
    # qw_ref/out_ref: (tb, ts, L); cos/sin_e/sin_o: (ts, L) in the compute dtype.
    qw = qw_ref[...]
    cos = cos_ref[...]
    if qw.dtype != cos.dtype:
        qw = qw.astype(cos.dtype)

    lane_axis = qw.ndim - 1
    up = pltpu.roll(qw, up_shift, lane_axis)      # up[..., j]   == qw[..., j+1 (mod L)]
    down = pltpu.roll(qw, down_shift, lane_axis)  # down[..., j] == qw[..., j-1 (mod L)]

    out = qw * cos[None] + up * sin_e_ref[...][None] + down * sin_o_ref[...][None]
    out_ref[...] = out.astype(out_ref.dtype)


# ----------------------------------------------------------------------------
# Module-like wrapper.
# ----------------------------------------------------------------------------
class RoPEPositionEncoding:
    def __init__(self, max_position: int, embedding_size: int):
        assert embedding_size % 2 == 0, "RoPE requires an even embedding size"
        self.max_position = max_position
        self.embedding_size = embedding_size

        cos, sin = make_rope_tables(max_position, embedding_size)   # (P, D) f32
        d = jnp.arange(embedding_size)
        even = (d % 2 == 0)[None, :]                                 # (1, D)
        self._cos = cos                                              # (P, D)
        self._sin_even = jnp.where(even, -sin, 0.0)                  # -sin on even d
        self._sin_odd = jnp.where(even, 0.0, sin)                    # +sin on odd d
        self._table_cache = {}

    def _tables(self, S, R, L, dtype):
        key = (int(S), int(R), int(L), jnp.dtype(dtype).name)
        tabs = self._table_cache.get(key)
        if tabs is None:
            tabs = tuple(
                t[:S].astype(dtype).reshape(R, L)
                for t in (self._cos, self._sin_even, self._sin_odd)
            )
            self._table_cache[key] = tabs
        return tabs

    def __call__(self, qw, seq_dim=-2):
        assert qw.ndim >= 2
        if seq_dim not in (-2, qw.ndim - 2):
            raise NotImplementedError("only seq_dim=-2 is supported")
        *lead, S, D = qw.shape
        assert D == self.embedding_size
        assert S <= self.max_position, "sequence longer than max_position"
        B = math.prod(lead) if lead else 1

        out_dtype = qw.dtype
        # TODO(synk): on v5e force f32 compute for bf16 inputs (no bf16 VPU).
        compute_dtype = jnp.bfloat16 if out_dtype == jnp.bfloat16 else jnp.float32

        # --- lane-dense repack: (B, S, D) -> (B, R, L), tables -> (R, L) -----
        N = S * D
        L = _pick_lane_width(N)
        if L is None:
            # TODO(synk): pad S so a multiple-of-128 lane width exists; this
            # fallback gives masked partial stores when D < 128.
            L = D
        R = N // L

        qw_r = qw.reshape(B, R, L)                       # contiguous, pair-preserving
        cos_r, sin_e_r, sin_o_r = self._tables(S, R, L, compute_dtype)

        # --- generation-aware tile choice ------------------------------------
        itemsize = jnp.dtype(out_dtype).itemsize
        cap = _vmem_capacity_bytes()
        tile_target = (3 << 20) if cap <= (64 << 20) else (6 << 20)   # qw bytes/step
        vmem_limit = int(max(32 << 20, min(96 << 20, (cap * 3) // 4)))

        sub = 8 if itemsize >= 4 else 16                 # sublane multiple
        bytes_per_row = L * itemsize
        rows_fit = max(1, tile_target // bytes_per_row)
        if rows_fit >= R:
            ts = R
            tb = max(1, min(B, rows_fit // R))
        else:
            tb = 1
            ts = min(R, max(sub, (rows_fit // sub) * sub))

        # Megacore: give v7x's 2 TensorCores >= 2 parallel blocks on non-tiny calls.
        total_bytes = B * R * L * itemsize
        if total_bytes >= (1 << 20) and pl.cdiv(R, ts) * pl.cdiv(B, tb) < 2:
            if B >= 2:
                tb = pl.cdiv(B, 2)
            elif R >= 2 * sub:
                ts = pl.cdiv(pl.cdiv(R, 2), sub) * sub

        grid = (pl.cdiv(R, ts), pl.cdiv(B, tb))          # row tiles OUTER, batch INNER

        if _pltpu_roll_matches_jnp():
            up_shift, down_shift = L - 1, 1
        else:
            up_shift, down_shift = 1, L - 1

        kernel = functools.partial(
            _rope_kernel, up_shift=up_shift, down_shift=down_shift)

        out = pl.pallas_call(
            kernel,
            out_shape=jax.ShapeDtypeStruct((B, R, L), out_dtype),
            grid_spec=pltpu.PrefetchScalarGridSpec(
                num_scalar_prefetch=0,
                grid=grid,
                in_specs=[
                    pl.BlockSpec((tb, ts, L), lambda s, b: (b, s, 0)),
                    pl.BlockSpec((ts, L), lambda s, b: (s, 0)),   # constant over inner
                    pl.BlockSpec((ts, L), lambda s, b: (s, 0)),   # batch loop -> no
                    pl.BlockSpec((ts, L), lambda s, b: (s, 0)),   # re-DMA of tables
                ],
                out_specs=pl.BlockSpec((tb, ts, L), lambda s, b: (b, s, 0)),
            ),
            compiler_params=pltpu.CompilerParams(
                dimension_semantics=("parallel", "parallel"),
                vmem_limit_bytes=vmem_limit,
            ),
        )(qw_r, cos_r, sin_e_r, sin_o_r)

        return out.reshape(qw.shape)


# ----------------------------------------------------------------------------
# Pure-JAX reference (matches the PyTorch forward exactly).
# ----------------------------------------------------------------------------
def rope_reference(qw, cos_position, sin_position):
    S = qw.shape[-2]
    even = qw[..., 0::2]
    odd = qw[..., 1::2]
    qw2 = jnp.stack([-odd, even], axis=-1).reshape(qw.shape)
    return qw * cos_position[:S] + qw2 * sin_position[:S]


if __name__ == "__main__":
    max_position = 16
    embedding_size = 32
    B, S, D = 2, 8, embedding_size

    key = jax.random.PRNGKey(0)
    qw = jax.random.normal(key, (B, S, D), dtype=jnp.float32)

    rope = RoPEPositionEncoding(max_position, embedding_size)
    out = rope(qw)
    out = jax.block_until_ready(out)

    cos_position, sin_position = make_rope_tables(max_position, embedding_size)
    ref = rope_reference(qw, cos_position, sin_position)

    assert out.shape == (B, S, D)
    assert jnp.allclose(out, ref, atol=1e-5, rtol=1e-5), "mismatch vs reference"

    print("KERNEL_OK")
</pallas_src>

<mosaic_0001>
module attributes {stable_mosaic.version = 11 : i64} {
  func.func @probe_kernel(%arg0: memref<8x128xf32, #tpu.memory_space<vmem>>, %arg1: memref<8x128xf32, #tpu.memory_space<vmem>>) attributes {dimension_semantics = [], scalar_prefetch = 0 : i64, scratch_operands = 0 : i64, tpu.core_type = #tpu.core_type<tc>} {
    %c0 = arith.constant 0 : index
    %c0_0 = arith.constant 0 : index
    %0 = vector.load %arg0[%c0, %c0_0] : memref<8x128xf32, #tpu.memory_space<vmem>>, vector<8x128xf32>
    %c1_i32 = arith.constant 1 : i32
    %1 = tpu.dynamic_rotate %0 by %c1_i32 dim 1 : vector<8x128xf32>, i32 -> vector<8x128xf32>
    %c0_1 = arith.constant 0 : index
    %c0_2 = arith.constant 0 : index
    %2 = vector.load %arg1[%c0_1, %c0_2] : memref<8x128xf32, #tpu.memory_space<vmem>>, vector<8x128xf32>
    tpu.vector_store %arg1[%c0_1, %c0_2], %1 {strides = array<i32>} : memref<8x128xf32, #tpu.memory_space<vmem>>, vector<8x128xf32>,
    return
  }
}

module attributes {stable_mosaic.version = 11 : i64} {
  func.func @_rope_kernel(%arg0: i32, %arg1: i32, %arg2: memref<2x1x256xf32, #tpu.memory_space<vmem>>, %arg3: memref<1x256xf32, #tpu.memory_space<vmem>>, %arg4: memref<1x256xf32, #tpu.memory_space<vmem>>, %arg5: memref<1x256xf32, #tpu.memory_space<vmem>>, %arg6: memref<2x1x256xf32, #tpu.memory_space<vmem>>) attributes {dimension_semantics = [#tpu.dimension_semantics<parallel>, #tpu.dimension_semantics<parallel>], iteration_bounds = array<i64: 1, 1>, scalar_prefetch = 0 : i64, scratch_operands = 0 : i64, tpu.core_type = #tpu.core_type<tc>, window_params = [{transform_indices = @transform_0, window_bounds = array<i64: 2, 1, 256>}, {transform_indices = @transform_1, window_bounds = array<i64: 1, 256>}, {transform_indices = @transform_2, window_bounds = array<i64: 1, 256>}, {transform_indices = @transform_3, window_bounds = array<i64: 1, 256>}, {transform_indices = @transform_4, window_bounds = array<i64: 2, 1, 256>}]} {
    %c0 = arith.constant 0 : index
    %c0_0 = arith.constant 0 : index
    %c0_1 = arith.constant 0 : index
    %0 = vector.load %arg2[%c0, %c0_0, %c0_1] : memref<2x1x256xf32, #tpu.memory_space<vmem>>, vector<2x1x256xf32>
    %c0_2 = arith.constant 0 : index
    %c0_3 = arith.constant 0 : index
    %1 = vector.load %arg3[%c0_2, %c0_3] : memref<1x256xf32, #tpu.memory_space<vmem>>, vector<1x256xf32>
    %c255_i32 = arith.constant 255 : i32
    %2 = tpu.dynamic_rotate %0 by %c255_i32 dim 2 : vector<2x1x256xf32>, i32 -> vector<2x1x256xf32>
    %c1_i32 = arith.constant 1 : i32
    %3 = tpu.dynamic_rotate %0 by %c1_i32 dim 2 : vector<2x1x256xf32>, i32 -> vector<2x1x256xf32>
    %4 = vector.shape_cast %1 : vector<1x256xf32> to vector<1x1x256xf32>
    %5 = vector.broadcast %4 : vector<1x1x256xf32> to vector<2x1x256xf32>
    %6 = arith.mulf %0, %5 : vector<2x1x256xf32>
    %c0_4 = arith.constant 0 : index
    %c0_5 = arith.constant 0 : index
    %7 = vector.load %arg4[%c0_4, %c0_5] : memref<1x256xf32, #tpu.memory_space<vmem>>, vector<1x256xf32>
    %8 = vector.shape_cast %7 : vector<1x256xf32> to vector<1x1x256xf32>
    %9 = vector.broadcast %8 : vector<1x1x256xf32> to vector<2x1x256xf32>
    %10 = arith.mulf %2, %9 : vector<2x1x256xf32>
    %11 = arith.addf %6, %10 : vector<2x1x256xf32>
    %c0_6 = arith.constant 0 : index
    %c0_7 = arith.constant 0 : index
    %12 = vector.load %arg5[%c0_6, %c0_7] : memref<1x256xf32, #tpu.memory_space<vmem>>, vector<1x256xf32>
    %13 = vector.shape_cast %12 : vector<1x256xf32> to vector<1x1x256xf32>
    %14 = vector.broadcast %13 : vector<1x1x256xf32> to vector<2x1x256xf32>
    %15 = arith.mulf %3, %14 : vector<2x1x256xf32>
    %16 = arith.addf %11, %15 : vector<2x1x256xf32>
    %c0_8 = arith.constant 0 : index
    %c0_9 = arith.constant 0 : index
    %c0_10 = arith.constant 0 : index
    %17 = vector.load %arg6[%c0_8, %c0_9, %c0_10] : memref<2x1x256xf32, #tpu.memory_space<vmem>>, vector<2x1x256xf32>
    tpu.vector_store %arg6[%c0_8, %c0_9, %c0_10], %16 {strides = array<i32>} : memref<2x1x256xf32, #tpu.memory_space<vmem>>, vector<2x1x256xf32>,
    return
  }
  func.func @transform_0(%arg0: i32, %arg1: i32) -> (i32, i32, i32) {
    %c0_i32 = arith.constant 0 : i32
    %c0_i32_0 = arith.constant 0 : i32
    return %arg1, %arg0, %c0_i32 : i32, i32, i32
  }
  func.func @transform_1(%arg0: i32, %arg1: i32) -> (i32, i32) {
    %c0_i32 = arith.constant 0 : i32
    %c0_i32_0 = arith.constant 0 : i32
    return %arg0, %c0_i32 : i32, i32
  }
  func.func @transform_2(%arg0: i32, %arg1: i32) -> (i32, i32) {
    %c0_i32 = arith.constant 0 : i32
    %c0_i32_0 = arith.constant 0 : i32
    return %arg0, %c0_i32 : i32, i32
  }
  func.func @transform_3(%arg0: i32, %arg1: i32) -> (i32, i32) {
    %c0_i32 = arith.constant 0 : i32
    %c0_i32_0 = arith.constant 0 : i32
    return %arg0, %c0_i32 : i32, i32
  }
  func.func @transform_4(%arg0: i32, %arg1: i32) -> (i32, i32, i32) {
    %c0_i32 = arith.constant 0 : i32
    %c0_i32_0 = arith.constant 0 : i32
    return %arg1, %arg0, %c0_i32 : i32, i32, i32
  }
}

</mosaic_0001>

<bundles_post_ra>
// kernel: tpu_custom_call.1
= control target key start
LH: loop header
LB: loop body
LE: loop exit
PB: predicated region body
PF: predicated region fallthrough
CT: control target
= control target key end

     0   :  { %6 = vsyncpa [#allocation3], 0  ;;  %s106_s0 = inlined_call_operand.hbm [shape: f32[8,128], index: 0, kind: input, shape index: {}]   ;;  %s107_s1 = inlined_call_operand.hbm [shape: f32[8,128], index: 1, kind: output, shape index: {}]  }
   0x1   :  { %7 = vsyncpa [#allocation4], 0  ;;  %s87_s6 = smov [#allocation2]  }
   0x2   :  { %s14_s7 = sshll.u32 %s87_s6, 4  ;;  %s15_s7 = int_to_ptr.vmem [resolvable:$true] %s14_s7 }
   0x3   :  { %s51_s8 = scalar_lea.vmem %s15_s7, 128  ;;  %p56_p1 = scmp.lt.s32.totalorder %s15_s7, %s15_s7 }
   0x4   :  { %p52_p0 = scmp.ne.s32.totalorder %s15_s7, %s51_s8  ;;  %p57_p2 = scmp.lt.s32.totalorder %s51_s8, %s51_s8 }
   0x6   :  { %p58_p3 = por %p57_p2, %p56_p1 }
   0x8   :  { %p59_p4 = pnand %p58_p3, %p52_p0 }
   0xa   :  { %62 = shalt.err (!%p59_p4)
}
   0xb   :  { %17 = dma.hbm_to_vmem [thread:$0]  %s106_s0, 128, %s15_s7, [#allocation3]  }
   0xc   :  { %83 = dma.done.wait [#allocation3], 128  }
   0xd   :  { %84 = vsyncadd [#allocation3], 4294967168  ;;  %v21_v0 = vld [vmem:[#allocation2] sm:$0xff]  ;;  %s88_s11 = smov 1   ;;  %s89_s12 = smov [#allocation5]  }
   0xe   :  { %22 = vrot.lane.b32.xlu0 %v21_v0, %s88_s11  ;;  %s31_s13 = sshll.u32 %s89_s12, 4  ;;  %s32_s13 = int_to_ptr.vmem [resolvable:$true] %s31_s13 }
   0xf   :  { %s63_s14 = scalar_lea.vmem %s32_s13, 128  ;;  %p68_p6 = scmp.lt.s32.totalorder %s32_s13, %s32_s13 }
  0x10   :  { %p64_p5 = scmp.ne.s32.totalorder %s32_s13, %s63_s14  ;;  %p69_p7 = scmp.lt.s32.totalorder %s63_s14, %s63_s14 }
  0x12   :  { %p70_p8 = por %p69_p7, %p68_p6 }
  0x14   :  { %p71_p9 = pnand %p70_p8, %p64_p5 }
  0x80   :  { %v23_v1 = vpop.permute.xlu0 %22 }
  0x81   :  { %24 = vst [vmem:[#allocation5] sm:$0xff] %v23_v1 }
  0x82   :  { %74 = shalt.err (!%p71_p9)
}
  0x83   :  { %34 = dma.vmem_to_hbm [thread:$0]  %s32_s13, 128, %s107_s1, [#allocation4]  }
  0x84   :  { %85 = dma.done.wait [#allocation4], 128  }
  0x85   :  { %86 = vsyncadd [#allocation4], 4294967168 }
  0x86   :  { %38 = vsyncpa [#allocation3], 1 }
  0x87   :  { %39 = vsyncpa [#allocation4], 1 }

// kernel: tpu_custom_call.1
= control target key start
LH: loop header
LB: loop body
LE: loop exit
PB: predicated region body
PF: predicated region fallthrough
CT: control target
= control target key end

     0   :  { %9 = vsyncpa [#allocation3], 0  ;;  %s362_s0 = inlined_call_operand.hbm [shape: f32[2,1,256], index: 0, kind: input, shape index: {}]   ;;  %s363_s1 = inlined_call_operand.hbm [shape: f32[1,256], index: 1, kind: input, shape index: {}]   ;;  %s364_s2 = inlined_call_operand.vmem [shape: f32[1,256], index: 2, kind: input, shape index: {}]   ;;  %s365_s3 = inlined_call_operand.vmem [shape: f32[1,256], index: 3, kind: input, shape index: {}]   ;;  %s366_s4 = inlined_call_operand.hbm [shape: f32[2,1,256], index: 4, kind: output, shape index: {}]  }
   0x1   :  { %10 = vsyncpa [#allocation6], 0 }
   0x2   :  { %11 = vsyncpa [#allocation4], 0  ;;  %s305_s15 = smov [#allocation2]  }
   0x3   :  { %s17_s16 = sshll.u32 %s305_s15, 4  ;;  %s18_s16 = int_to_ptr.vmem [resolvable:$true] %s17_s16 }
   0x4   :  { %s247_s17 = scalar_lea.vmem %s18_s16, 64  ;;  %p252_p1 = scmp.lt.s32.totalorder %s18_s16, %s18_s16 }
   0x5   :  { %p248_p0 = scmp.ne.s32.totalorder %s18_s16, %s247_s17  ;;  %p253_p2 = scmp.lt.s32.totalorder %s247_s17, %s247_s17 }
   0x7   :  { %p254_p3 = por %p253_p2, %p252_p1 }
   0x9   :  { %p255_p4 = pnand %p254_p3, %p248_p0 }
   0xb   :  { %258 = shalt.err (!%p255_p4)
}
   0xc   :  { %s306_s18 = smov 32   ;;  %s307_s19 = smov 2  }
   0xd   :  { %23 = dma.hbm_to_vmem [thread:$0]  %s362_s0, 64, %s18_s16, [#allocation3], %s306_s18, %s306_s18, %s307_s19  }
   0xe   :  { %s308_s22 = smov [#allocation5]  }
   0xf   :  { %s30_s23 = sshll.u32 %s308_s22, 4  ;;  %s31_s23 = int_to_ptr.vmem [resolvable:$true] %s30_s23 }
  0x10   :  { %s267_s24 = scalar_lea.vmem %s31_s23, 32  ;;  %p272_p6 = scmp.lt.s32.totalorder %s31_s23, %s31_s23 }
  0x11   :  { %p268_p5 = scmp.ne.s32.totalorder %s31_s23, %s267_s24  ;;  %p273_p7 = scmp.lt.s32.totalorder %s267_s24, %s267_s24 }
  0x13   :  { %p274_p8 = por %p273_p7, %p272_p6 }
  0x15   :  { %p275_p9 = pnand %p274_p8, %p268_p5 }
  0x17   :  { %278 = shalt.err (!%p275_p9)
}
  0x18   :  { %33 = dma.hbm_to_vmem [thread:$0]  %s363_s1, 32, %s31_s23, [#allocation6]  }
  0x19   :  { %299 = dma.done.wait [#allocation3], 64  }
  0x1a   :  { %300 = vsyncadd [#allocation3], 4294967232 }
  0x1b   :  { %301 = dma.done.wait [#allocation6], 32  }
  0x1c   :  { %302 = vsyncadd [#allocation6], 4294967264  ;;  %v49_v0 = vlaneseq  ;;  %v44_v4 = vld [vmem:[#allocation2] sm:$0x3]  ;;  %v45_v5 = vld [vmem:[#allocation2 + $0x2] sm:$0x3] }
  0x1d   :  { %s309_s0 = smov 127   ;;  %s310_s1 = smov 1   ;;  %v311_v10 = vmov 1966171168   ;;  %v99_v13 = vld [vmem:[%s364_s2] sm:$0x3] }
  0x1e   :  { %v50_v1 = vshrl.u32 %v49_v0, 7  ;;  %v121_v11 = vunpack.c.l.s4 %v311_v10  ;;  %v78_v12 = vand.u32 127, %v49_v0  ;;  %v46_v24 = vld [vmem:[#allocation5] sm:$0x3]  ;;  %v153_v34 = vld [vmem:[%s365_s3] sm:$0x3] }
  0x1f   :  { %v97_v30 = vmul.f32 %v46_v24, %v44_v4  ;;  %v98_v43 = vmul.f32 %v46_v24, %v45_v5  ;;  %s312_s3 = smov [#allocation7]   ;;  %vm209_vm2 = vcmp.lt.s32.totalorder %v49_v0, 256 }
  0x20   :  { %v55_v2 = vsub.s32 1, %v50_v1  ;;  %v51_v3 = vsub.s32 0, %v50_v1  ;;  %v122_v14 = vunpack.c.0.s8 %v121_v11  ;;  %vm79_vm0 = vcmp.lt.s32.totalorder %v78_v12, 127  ;;  %s218_s30 = sshll.u32 %s312_s3, 4  ;;  %s219_s30 = int_to_ptr.vmem [resolvable:$true] %s218_s30 }
  0x21   :  { %vm92_vm1 = vcmp.lt.s32.totalorder %v78_v12, 1  ;;  %s279_s5 = scalar_lea.vmem %s219_s30, 64  ;;  %p284_p11 = scmp.lt.s32.totalorder %s219_s30, %s219_s30 }
  0x22   :  { %v56_v6 = vrot.slane %v44_v4, %v55_v2  ;;  %v52_v7 = vrot.slane %v44_v4, %v51_v3  ;;  %v64_v8 = vrot.slane %v45_v5, %v55_v2  ;;  %v60_v9 = vrot.slane %v45_v5, %v51_v3  ;;  %p280_p10 = scmp.ne.s32.totalorder %s219_s30, %s279_s5  ;;  %p285_p12 = scmp.lt.s32.totalorder %s279_s5, %s279_s5 }
  0x23   :  { %v104_v15 = vrot.slane %v99_v13, %v51_v3  ;;  %v108_v16 = vrot.slane %v99_v13, %v55_v2  ;;  %v125_v21 = vsub.s32 %v122_v14, %v50_v1  ;;  %v158_v40 = vrot.slane %v153_v34, %v51_v3 }
  0x24   :  { %73 = vrot.lane.b32.xlu1 %v56_v6, %s309_s0  ;;  %69 = vrot.lane.b32.xlu0 %v52_v7, %s309_s0  ;;  %v162_v41 = vrot.slane %v153_v34, %v55_v2  ;;  %p286_p13 = por %p285_p12, %p284_p11 }
  0x26   :  { %p287_p0 = pnand %p286_p13, %p280_p10 }
  0x28   :  { %75 = vrot.lane.b32.xlu1 %v64_v8, %s309_s0  ;;  %71 = vrot.lane.b32.xlu0 %v60_v9, %s309_s0 }
  0x2c   :  { %86 = vrot.lane.b32.xlu1 %v60_v9, %s310_s1  ;;  %84 = vrot.lane.b32.xlu0 %v52_v7, %s310_s1 }
  0x30   :  { %90 = vrot.lane.b32.xlu1 %v64_v8, %s310_s1  ;;  %88 = vrot.lane.b32.xlu0 %v56_v6, %s310_s1 }
  0x96   :  { %v74_v17 = vpop.permute.xlu1 %73  ;;  %v70_v18 = vpop.permute.xlu0 %69 }
  0x97   :  { %v80_v19 = vsel %vm79_vm0, %v70_v18, %v74_v17  ;;  %v82_v20 = vsel %vm79_vm0, %v74_v17, %v70_v18 }
  0x98   :  { %v111_v22 = vmul.f32 %v104_v15, %v80_v19  ;;  %v112_v23 = vmul.f32 %v108_v16, %v82_v20 }
  0x9a   :  { %v119_v25 = vcombine.low %v111_v22, %v112_v23  ;;  %v76_v26 = vpop.permute.xlu1 %75  ;;  %v72_v27 = vpop.permute.xlu0 %71 }
  0x9b   :  { %v81_v28 = vsel %vm79_vm0, %v72_v27, %v76_v26  ;;  %v83_v29 = vsel %vm79_vm0, %v76_v26, %v72_v27 }
  0x9c   :  { %v126_v31 = vrot.slane %v119_v25, %v125_v21  ;;  %v113_v32 = vmul.f32 %v104_v15, %v81_v28  ;;  %v114_v33 = vmul.f32 %v108_v16, %v83_v29 }
  0x9e   :  { %v133_v35 = vrot.slane %v126_v31, %v125_v21  ;;  %v134_v36 = vcombine.low %v113_v32, %v114_v33  ;;  %v87_v37 = vpop.permute.xlu1 %86  ;;  %v85_v38 = vpop.permute.xlu0 %84 }
  0xa0   :  { %v141_v39 = vrot.slane %v134_v36, %v125_v21  ;;  %v151_v42 = vadd.f32 %v133_v35, %v97_v30 }
  0xa2   :  { %v148_v44 = vrot.slane %v141_v39, %v125_v21  ;;  %v91_v45 = vpop.permute.xlu1 %90  ;;  %v89_v46 = vpop.permute.xlu0 %88 }
  0xa3   :  { %v94_v47 = vsel %vm92_vm1, %v87_v37, %v91_v45  ;;  %v96_v48 = vsel %vm92_vm1, %v91_v45, %v87_v37  ;;  %v93_v49 = vsel %vm92_vm1, %v85_v38, %v89_v46  ;;  %v95_v50 = vsel %vm92_vm1, %v89_v46, %v85_v38 }
  0xa4   :  { %v167_v51 = vmul.f32 %v158_v40, %v96_v48  ;;  %v168_v52 = vmul.f32 %v162_v41, %v94_v47  ;;  %v165_v53 = vmul.f32 %v158_v40, %v95_v50  ;;  %v166_v54 = vmul.f32 %v162_v41, %v93_v49 }
  0xa5   :  { %v152_v55 = vadd.f32 %v148_v44, %v98_v43 }
  0xa6   :  { %v188_v56 = vcombine.low %v167_v51, %v168_v52  ;;  %v173_v57 = vcombine.low %v165_v53, %v166_v54 }
  0xa8   :  { %v195_v58 = vrot.slane %v188_v56, %v125_v21  ;;  %v180_v59 = vrot.slane %v173_v57, %v125_v21 }
  0xaa   :  { %v202_v60 = vrot.slane %v195_v58, %v125_v21  ;;  %v187_v61 = vrot.slane %v180_v59, %v125_v21 }
  0xac   :  { %v205_v62 = vadd.f32 %v187_v61, %v151_v42  ;;  %v206_v63 = vadd.f32 %v202_v60, %v152_v55 }
  0xae   :  { %211 = vst.msk [vmem:[#allocation7] sm:$0x3] %vm209_vm2, %v205_v62  ;;  %212 = vst.msk [vmem:[#allocation7 + $0x2] sm:$0x3] %vm209_vm2, %v206_v63 }
  0xaf   :  { %290 = shalt.err (!%p287_p0)
}
  0xb0   :  { %224 = dma.vmem_to_hbm [thread:$0]  %s219_s30, 64, %s366_s4, [#allocation4], %s306_s18, %s306_s18, %s307_s19  }
  0xb1   :  { %303 = dma.done.wait [#allocation4], 64  }
  0xb2   :  { %304 = vsyncadd [#allocation4], 4294967232 }
  0xb3   :  { %228 = vsyncpa [#allocation3], 1 }
  0xb4   :  { %229 = vsyncpa [#allocation6], 1 }
  0xb5   :  { %230 = vsyncpa [#allocation4], 1 }

</bundles_post_ra>
